<compile_context>
chip_gen: v6e
topology: v6e:2x2x1
jax: 0.10.0
libtpu: 0.0.40
codegen_flags: <defaults>
</compile_context>

<pallas_src>
import functools

import jax
import jax.numpy as jnp
import numpy as np
from jax.experimental import pallas as pl
from jax.experimental.pallas import tpu as pltpu  # noqa: F401  (not needed at this size)

NUM_ANCHORS = 9
ANCHOR_DIM = 4
HIDDEN1 = 64
HIDDEN2 = 32

# ---- packed-parameter slab layout (rows; each segment starts 8-row aligned) ----
A_R0 = 0       # anchors (9, 4)    rows   0:9,   lanes 0:4
W1_R0 = 16     # W1      (4, 64)   rows  16:20,  lanes 0:64
B1_R0 = 24     # b1      (1, 64)   rows  24:25,  lanes 0:64
W2_R0 = 32     # W2^T    (32, 64)  rows  32:64,  lanes 0:64
B2_R0 = 64     # b2      (32, 1)   rows  64:96,  lane  0     (stored as a column)
W3_R0 = 96     # W3      (32, 4)   rows  96:128, lanes 0:4
B3_R0 = 128    # b3      (1, 4)    rows 128:129, lanes 0:4
SLAB_ROWS = 136
SLAB_LANES = 128


def _anchor_kernel(inv_hw, feat_ref, params_ref, out_ref):
    # --- adaptive_avg_pool2d((1,1)): mean over the flattened spatial axis ----
    # feat_ref: (C, HW).  Keep the result as a COLUMN (C, 1) so layer 1 is a
    # plain sublane-broadcast multiply (no scalar extraction, no MXU).
    pooled = jnp.sum(feat_ref[...], axis=-1, keepdims=True) * inv_hw       # (C, 1)

    # --- static views into the packed parameter slab (zero runtime cost) ----
    anchors = params_ref[A_R0:A_R0 + NUM_ANCHORS, 0:ANCHOR_DIM]            # (9, 4)
    w1 = params_ref[W1_R0:W1_R0 + ANCHOR_DIM, 0:HIDDEN1]                   # (4, 64)
    b1 = params_ref[B1_R0:B1_R0 + 1, 0:HIDDEN1]                            # (1, 64)
    w2t = params_ref[W2_R0:W2_R0 + HIDDEN2, 0:HIDDEN1]                     # (32, 64) = W2^T
    b2 = params_ref[B2_R0:B2_R0 + HIDDEN2, 0:1]                            # (32, 1)
    w3 = params_ref[W3_R0:W3_R0 + HIDDEN2, 0:ANCHOR_DIM]                   # (32, 4)
    b3 = params_ref[B3_R0:B3_R0 + 1, 0:ANCHOR_DIM]                         # (1, 4)

    # --- refinement_net on the VPU (broadcast-FMA + tiny XLU reduces) --------
    # Layer 1: (C,1) * (C,64) -> sublane reduce -> (1,64)
    h1 = jnp.sum(pooled * w1, axis=0, keepdims=True) + b1
    h1 = jnp.maximum(h1, 0.0)
    # Layer 2: (1,64) * (32,64) -> lane reduce -> (32,1)
    h2 = jnp.sum(h1 * w2t, axis=-1, keepdims=True) + b2
    h2 = jnp.maximum(h2, 0.0)
    # Layer 3: (32,1) * (32,4) -> sublane reduce -> (1,4), then Tanh (EUP)
    delta = jnp.tanh(jnp.sum(h2 * w3, axis=0, keepdims=True) + b3)

    # refined_anchors = anchor_params + 0.1 * delta   ((9,4) + (1,4) broadcast)
    out_ref[...] = anchors + 0.1 * delta


def pack_params(anchors, w1, b1, w2, b2, w3, b3):
    """Pack every parameter into one (136, 128) f32 slab -> a single DMA.

    Do this once per weight update (e.g. under jit) and reuse the slab.
    """
    slab = jnp.zeros((SLAB_ROWS, SLAB_LANES), jnp.float32)
    slab = slab.at[A_R0:A_R0 + NUM_ANCHORS, 0:ANCHOR_DIM].set(anchors)
    slab = slab.at[W1_R0:W1_R0 + ANCHOR_DIM, 0:HIDDEN1].set(w1)
    slab = slab.at[B1_R0:B1_R0 + 1, 0:HIDDEN1].set(b1)
    slab = slab.at[W2_R0:W2_R0 + HIDDEN2, 0:HIDDEN1].set(w2.T)   # store W2 transposed
    slab = slab.at[B2_R0:B2_R0 + HIDDEN2, 0:1].set(b2.T)         # store b2 as a column
    slab = slab.at[W3_R0:W3_R0 + HIDDEN2, 0:ANCHOR_DIM].set(w3)
    slab = slab.at[B3_R0:B3_R0 + 1, 0:ANCHOR_DIM].set(b3)
    return slab


def adaptive_anchor_box(features, param_slab):
    """features: (1, C, H, W) float32 with C == ANCHOR_DIM; param_slab from pack_params."""
    B, C, H, W = features.shape
    assert B == 1, "PyTorch broadcast (num_anchors,4) + (B,4) requires B == 1"
    assert C == ANCHOR_DIM, "refinement_net input dim must equal anchor_dim"
    hw = H * W
    # Drop the size-1 batch dim: the kernel sees a 2-D (C, HW) tile.
    x = features.reshape(C, hw).astype(jnp.float32)

    kernel = functools.partial(_anchor_kernel, 1.0 / hw)

    cost = pl.CostEstimate(
        flops=C * hw
        + 2 * (ANCHOR_DIM * HIDDEN1 + HIDDEN1 * HIDDEN2 + HIDDEN2 * ANCHOR_DIM)
        + 2 * NUM_ANCHORS * ANCHOR_DIM,
        transcendentals=ANCHOR_DIM,
        bytes_accessed=(x.size + SLAB_ROWS * SLAB_LANES + NUM_ANCHORS * ANCHOR_DIM) * 4,
    )

    # NOTE: for this problem size (C=4, HW=256) a single whole-array block is
    # optimal; if H*W ever grows large, add a grid axis over the spatial dim
    # with a lane-aligned block + VMEM accumulator (pl.when init/finalize) so
    # the DMA overlaps the reduction.
    return pl.pallas_call(
        kernel,
        out_shape=jax.ShapeDtypeStruct((NUM_ANCHORS, ANCHOR_DIM), jnp.float32),
        grid=(),
        in_specs=[
            pl.BlockSpec((C, hw), lambda: (0, 0)),
            pl.BlockSpec((SLAB_ROWS, SLAB_LANES), lambda: (0, 0)),
        ],
        out_specs=pl.BlockSpec((NUM_ANCHORS, ANCHOR_DIM), lambda: (0, 0)),
        cost_estimate=cost,
    )(x, param_slab)


def init_params(key):
    """Deterministic parameter init mirroring the module's shapes."""
    k_anchor, k1, kb1, k2, kb2, k3, kb3 = jax.random.split(key, 7)
    # anchor_params = randn(num_anchors, anchor_dim) * 0.1
    anchors = 0.1 * jax.random.normal(k_anchor, (NUM_ANCHORS, ANCHOR_DIM), jnp.float32)

    def linear_init(kw, kb, fan_in, fan_out):
        bound = 1.0 / jnp.sqrt(jnp.float32(fan_in))
        w = jax.random.uniform(kw, (fan_in, fan_out), jnp.float32, -bound, bound)
        b = jax.random.uniform(kb, (1, fan_out), jnp.float32, -bound, bound)
        return w, b

    w1, b1 = linear_init(k1, kb1, ANCHOR_DIM, HIDDEN1)
    w2, b2 = linear_init(k2, kb2, HIDDEN1, HIDDEN2)
    w3, b3 = linear_init(k3, kb3, HIDDEN2, ANCHOR_DIM)
    return anchors, w1, b1, w2, b2, w3, b3


def _reference(features, anchors, w1, b1, w2, b2, w3, b3):
    """Pure-JAX reference mirroring the PyTorch forward."""
    B, C, H, W = features.shape
    pooled = jnp.mean(features.reshape(B, C, H * W), axis=-1)           # (B, C)
    h = jnp.maximum(pooled @ w1 + b1, 0.0)
    h = jnp.maximum(h @ w2 + b2, 0.0)
    delta = jnp.tanh(h @ w3 + b3)
    return anchors + 0.1 * delta


if __name__ == "__main__":
    key = jax.random.PRNGKey(0)
    k_feat, k_params = jax.random.split(key)

    B, C, H, W = 1, ANCHOR_DIM, 16, 16   # C must equal anchor_dim; B=1 per module contract
    features = jax.random.normal(k_feat, (B, C, H, W), jnp.float32)
    params = init_params(k_params)
    param_slab = pack_params(*params)

    refined_anchors = adaptive_anchor_box(features, param_slab)
    jax.block_until_ready(refined_anchors)

    assert refined_anchors.shape == (NUM_ANCHORS, ANCHOR_DIM)
    assert refined_anchors.dtype == jnp.float32

    expected = _reference(features, *params)
    assert np.allclose(np.asarray(refined_anchors), np.asarray(expected),
                       atol=1e-5, rtol=1e-5), "kernel does not match reference"
    print("KERNEL_OK")
</pallas_src>

<mosaic_0001>
module attributes {stable_mosaic.version = 11 : i64} {
  func.func @_anchor_kernel(%arg0: memref<4x256xf32, #tpu.memory_space<vmem>>, %arg1: memref<136x128xf32, #tpu.memory_space<vmem>>, %arg2: memref<9x4xf32, #tpu.memory_space<vmem>>) attributes {dimension_semantics = [], scalar_prefetch = 0 : i64, scratch_operands = 0 : i64, tpu.core_type = #tpu.core_type<tc>} {
    %c0 = arith.constant 0 : index
    %c0_0 = arith.constant 0 : index
    %0 = vector.load %arg0[%c0, %c0_0] : memref<4x256xf32, #tpu.memory_space<vmem>>, vector<4x256xf32>
    %cst = arith.constant dense<0.000000e+00> : vector<4xf32>
    %1 = vector.multi_reduction <add>, %0, %cst [1] : vector<4x256xf32> to vector<4xf32>
    %2 = vector.shape_cast %1 : vector<4xf32> to vector<4x1xf32>
    %cst_1 = arith.constant 3.906250e-03 : f32
    %3 = vector.broadcast %cst_1 : f32 to vector<4x1xf32>
    %4 = arith.mulf %2, %3 : vector<4x1xf32>
    %c0_2 = arith.constant 0 : index
    %c0_3 = arith.constant 0 : index
    %5 = vector.load %arg1[%c0_2, %c0_3] : memref<136x128xf32, #tpu.memory_space<vmem>>, vector<9x4xf32>
    %c16 = arith.constant 16 : index
    %c0_4 = arith.constant 0 : index
    %6 = vector.load %arg1[%c16, %c0_4] : memref<136x128xf32, #tpu.memory_space<vmem>>, vector<4x64xf32>
    %c24 = arith.constant 24 : index
    %c0_5 = arith.constant 0 : index
    %7 = vector.load %arg1[%c24, %c0_5] : memref<136x128xf32, #tpu.memory_space<vmem>>, vector<1x64xf32>
    %c32 = arith.constant 32 : index
    %c0_6 = arith.constant 0 : index
    %8 = vector.load %arg1[%c32, %c0_6] : memref<136x128xf32, #tpu.memory_space<vmem>>, vector<32x64xf32>
    %c64 = arith.constant 64 : index
    %c0_7 = arith.constant 0 : index
    %9 = vector.load %arg1[%c64, %c0_7] : memref<136x128xf32, #tpu.memory_space<vmem>>, vector<32x1xf32>
    %c96 = arith.constant 96 : index
    %c0_8 = arith.constant 0 : index
    %10 = vector.load %arg1[%c96, %c0_8] : memref<136x128xf32, #tpu.memory_space<vmem>>, vector<32x4xf32>
    %c128 = arith.constant 128 : index
    %c0_9 = arith.constant 0 : index
    %11 = vector.load %arg1[%c128, %c0_9] : memref<136x128xf32, #tpu.memory_space<vmem>>, vector<1x4xf32>
    %12 = vector.broadcast %4 : vector<4x1xf32> to vector<4x64xf32>
    %13 = arith.mulf %12, %6 : vector<4x64xf32>
    %cst_10 = arith.constant dense<0.000000e+00> : vector<64xf32>
    %14 = vector.multi_reduction <add>, %13, %cst_10 [0] : vector<4x64xf32> to vector<64xf32>
    %15 = vector.shape_cast %14 : vector<64xf32> to vector<1x64xf32>
    %16 = arith.addf %15, %7 : vector<1x64xf32>
    %cst_11 = arith.constant 0.000000e+00 : f32
    %17 = vector.broadcast %cst_11 : f32 to vector<1x64xf32>
    %18 = arith.maximumf %16, %17 : vector<1x64xf32>
    %19 = vector.broadcast %18 : vector<1x64xf32> to vector<32x64xf32>
    %20 = arith.mulf %19, %8 : vector<32x64xf32>
    %cst_12 = arith.constant dense<0.000000e+00> : vector<32xf32>
    %21 = vector.multi_reduction <add>, %20, %cst_12 [1] : vector<32x64xf32> to vector<32xf32>
    %22 = vector.shape_cast %21 : vector<32xf32> to vector<32x1xf32>
    %23 = arith.addf %22, %9 : vector<32x1xf32>
    %cst_13 = arith.constant 0.000000e+00 : f32
    %24 = vector.broadcast %cst_13 : f32 to vector<32x1xf32>
    %25 = arith.maximumf %23, %24 : vector<32x1xf32>
    %26 = vector.broadcast %25 : vector<32x1xf32> to vector<32x4xf32>
    %27 = arith.mulf %26, %10 : vector<32x4xf32>
    %cst_14 = arith.constant dense<0.000000e+00> : vector<4xf32>
    %28 = vector.multi_reduction <add>, %27, %cst_14 [0] : vector<32x4xf32> to vector<4xf32>
    %29 = vector.shape_cast %28 : vector<4xf32> to vector<1x4xf32>
    %30 = arith.addf %29, %11 : vector<1x4xf32>
    %31 = math.tanh %30 : vector<1x4xf32>
    %cst_15 = arith.constant 1.000000e-01 : f32
    %32 = vector.broadcast %cst_15 : f32 to vector<1x4xf32>
    %33 = arith.mulf %32, %31 : vector<1x4xf32>
    %34 = vector.broadcast %33 : vector<1x4xf32> to vector<9x4xf32>
    %35 = arith.addf %5, %34 : vector<9x4xf32>
    %c0_16 = arith.constant 0 : index
    %c0_17 = arith.constant 0 : index
    %36 = vector.load %arg2[%c0_16, %c0_17] : memref<9x4xf32, #tpu.memory_space<vmem>>, vector<9x4xf32>
    tpu.vector_store %arg2[%c0_16, %c0_17], %35 {strides = array<i32>} : memref<9x4xf32, #tpu.memory_space<vmem>>, vector<9x4xf32>,
    return
  }
}

</mosaic_0001>

<bundles_post_ra>
// kernel: tpu_custom_call.1
= control target key start
LH: loop header
LB: loop body
LE: loop exit
PB: predicated region body
PF: predicated region fallthrough
CT: control target
= control target key end

     0   :  { %7 = vsyncpa [#allocation3], 0  ;;  %s259_s0 = inlined_call_operand.hbm [shape: f32[4,256], index: 0, kind: input, shape index: {}]   ;;  %s260_s1 = inlined_call_operand.hbm [shape: f32[136,128], index: 1, kind: input, shape index: {}]   ;;  %s261_s2 = inlined_call_operand.vmem [shape: f32[9,4], index: 2, kind: output, shape index: {}]  }
   0x1   :  { %8 = vsyncpa [#allocation5], 0  ;;  %s215_s9 = smov [#allocation2]   ;;  %s216_s11 = smov [#allocation4]  }
   0x2   :  { %s15_s10 = sshll.u32 %s215_s9, 4  ;;  %s24_s12 = sshll.u32 %s216_s11, 4  ;;  %s16_s10 = int_to_ptr.vmem [resolvable:$true] %s15_s10  ;;  %s25_s12 = int_to_ptr.vmem [resolvable:$true] %s24_s12 }
   0x3   :  { %s179_s13 = scalar_lea.vmem %s16_s10, 128  ;;  %p184_p1 = scmp.lt.s32.totalorder %s16_s10, %s16_s10 }
   0x4   :  { %p180_p0 = scmp.ne.s32.totalorder %s16_s10, %s179_s13  ;;  %p185_p2 = scmp.lt.s32.totalorder %s179_s13, %s179_s13 }
   0x6   :  { %p186_p3 = por %p185_p2, %p184_p1 }
   0x8   :  { %p187_p4 = pnand %p186_p3, %p180_p0 }
   0xa   :  { %190 = shalt.err (!%p187_p4)
}
   0xb   :  { %18 = dma.hbm_to_vmem [thread:$0]  %s259_s0, 128, %s16_s10, [#allocation3]  }
   0xc   :  { %s199_s16 = scalar_lea.vmem %s25_s12, 2176  ;;  %p204_p6 = scmp.lt.s32.totalorder %s25_s12, %s25_s12 }
   0xd   :  { %p200_p5 = scmp.ne.s32.totalorder %s25_s12, %s199_s16  ;;  %p205_p7 = scmp.lt.s32.totalorder %s199_s16, %s199_s16 }
   0xf   :  { %p206_p8 = por %p205_p7, %p204_p6 }
  0x11   :  { %p207_p9 = pnand %p206_p8, %p200_p5 }
  0x13   :  { %210 = shalt.err (!%p207_p9)
}
  0x14   :  { %s217_s17 = smov 128   ;;  %s218_s18 = smov 8  }
  0x15   :  { %30 = dma.hbm_to_vmem [thread:$0]  %s260_s1, 2176, %s25_s12, [#allocation5], %s217_s17, %s217_s17, %s218_s18  }
  0x16   :  { %211 = dma.done.wait [#allocation3], 128  }
  0x17   :  { %212 = vsyncadd [#allocation3], 4294967168 }
  0x18   :  { %213 = dma.done.wait [#allocation5], 2176  }
  0x19   :  { %214 = vsyncadd [#allocation5], 4294965120  ;;  %vm41_vm0 = vcmask 1043456   ;;  %v37_v0 = vld [vmem:[#allocation2] sm:$0xff]  ;;  %v50_v5 = vld [vmem:[#allocation4 + $0x10] sm:$0xf]  ;;  %v76_v13 = vlaneseq }
  0x1a   :  { %v39_v1 = vcombine.high %v37_v0, %v37_v0  ;;  %v42_v2 = vsel %vm41_vm0, %v37_v0, 0.0  ;;  %vm66_vm1 = vcmask 519168   ;;  %v51_v17 = vld [vmem:[#allocation4 + $0x18] sm:$0x1]  ;;  %v53_v22 = vld [vmem:[#allocation4 + $0x28] sm:$0xff]  ;;  %v52_v23 = vld [vmem:[#allocation4 + $0x20] sm:$0xff] }
  0x1b   :  { %v241_v16 = vshrl.u32 %v76_v13, 7  ;;  %vm84_vm2 = vcmask 523264   ;;  %v54_v25 = vld [vmem:[#allocation4 + $0x30] sm:$0xff]  ;;  %v55_v26 = vld [vmem:[#allocation4 + $0x38] sm:$0xff]  ;;  %v219_v35 = vmov 0   ;;  %v57_v36 = vld [vmem:[#allocation4 + $0x48] sm:$0xff] }
  0x1c   :  { %v43_v3 = vsel %vm41_vm0, %v39_v1, 0.0  ;;  %167 = vset.pattern.permute.xlu0 %v219_v35  ;;  %166 = vset.pattern.permute.xlu1 %v219_v35  ;;  %v56_v37 = vld [vmem:[#allocation4 + $0x40] sm:$0xff]  ;;  %v58_v42 = vld [vmem:[#allocation4 + $0x50] sm:$0xff]  ;;  %v59_v46 = vld [vmem:[#allocation4 + $0x58] sm:$0xff]  ;;  %vm129_vm3 = vcmask 31744   ;;  %vm153_vm4 = vcmask 24576  }
  0x1d   :  { %v44_v4 = vadd.f32 %v43_v3, %v42_v2  ;;  %v78_v20 = vsub.s32 0, %v241_v16  ;;  %v60_v52 = vld [vmem:[#allocation4 + $0x60] sm:$0xff]  ;;  %v61_v53 = vld [vmem:[#allocation4 + $0x68] sm:$0xff]  ;;  %v62_v58 = vld [vmem:[#allocation4 + $0x70] sm:$0xff] }
  0x1e   :  { %v63_v63 = vld [vmem:[#allocation4 + $0x78] sm:$0xff] }
  0x1f   :  { %45 = vadd.xlane.f32.xlu0 %v44_v4 }
  0xa8   :  { %v46_v6 = vpop.xlane.xlu0 %45 }
  0xa9   :  { %v47_v7 = vmul.f32 0.00390625, %v46_v6 }
  0xab   :  { %v65_v8 = vmul.f32 %v50_v5, %v47_v7 }
  0xad   :  { %v67_v9 = vsel %vm66_vm1, %v65_v8, 0.0 }
  0xae   :  { %v68_v10 = vrot.slane %v67_v9, 4 }
  0xb0   :  { %v69_v11 = vadd.f32 %v68_v10, %v67_v9 }
  0xb2   :  { %v70_v12 = vrot.slane %v69_v11, 2 }
  0xb4   :  { %v71_v14 = vadd.f32 %v70_v12, %v69_v11  ;;  %v64_v12 = vld [vmem:[#allocation4 + $0x80] sm:$0x1] }
  0xb6   :  { %v72_v15 = vrot.slane %v71_v14, 1 }
  0xb8   :  { %v73_v18 = vadd.f32 %v72_v15, %v71_v14 }
  0xba   :  { %v74_v19 = vadd.f32 %v73_v18, %v51_v17  ;;  %v48_v18 = vld [vmem:[#allocation4] sm:$0xff] }
  0xbc   :  { %v75_v21 = vmax.f32 %v74_v19, 0.0  ;;  %v49_v19 = vld [vmem:[#allocation4 + $0x8] sm:$0x1] }
  0xbe   :  { %v79_v24 = vrot.slane %v75_v21, %v78_v20 }
  0xc0   :  { %v81_v27 = vmul.f32 %v79_v24, %v53_v22  ;;  %v80_v28 = vmul.f32 %v79_v24, %v52_v23  ;;  %v82_v31 = vmul.f32 %v79_v24, %v54_v25  ;;  %v83_v32 = vmul.f32 %v79_v24, %v55_v26 }
  0xc2   :  { %v88_v29 = vsel %vm84_vm2, %v81_v27, 0.0  ;;  %v85_v30 = vsel %vm84_vm2, %v80_v28, 0.0  ;;  %v91_v33 = vsel %vm84_vm2, %v82_v31, 0.0  ;;  %v94_v34 = vsel %vm84_vm2, %v83_v32, 0.0 }
  0xc3   :  { %89 = vadd.xlane.f32.xlu1 %v88_v29  ;;  %86 = vadd.xlane.f32.xlu0 %v85_v30 }
  0xc7   :  { %92 = vadd.xlane.f32.xlu1 %v91_v33  ;;  %95 = vadd.xlane.f32.xlu0 %v94_v34 }
 0x14c   :  { %v90_v38 = vpop.xlane.xlu1 %89  ;;  %v87_v39 = vpop.xlane.xlu0 %86 }
 0x14d   :  { %v98_v40 = vadd.f32 %v90_v38, %v57_v36  ;;  %v97_v41 = vadd.f32 %v87_v39, %v56_v37 }
 0x14f   :  { %v102_v43 = vmax.f32 %v98_v40, 0.0  ;;  %v101_v44 = vmax.f32 %v97_v41, 0.0 }
 0x150   :  { %v93_v45 = vpop.xlane.xlu1 %92  ;;  %v96_v47 = vpop.xlane.xlu0 %95 }
 0x151   :  { %v99_v48 = vadd.f32 %v93_v45, %v58_v42  ;;  %112 = vperm.xlu0 %167, %v102_v43   ;;  %107 = vperm.xlu1 %166, %v101_v44   ;;  %v100_v50 = vadd.f32 %v96_v47, %v59_v46 }
 0x153   :  { %v103_v49 = vmax.f32 %v99_v48, 0.0  ;;  %v104_v51 = vmax.f32 %v100_v50, 0.0 }
 0x155   :  { %117 = vperm.xlu1 %166, %v103_v49  }
 0x159   :  { %122 = vperm.xlu1 %166, %v104_v51  }
 0x1cc   :  { %v108_v54 = vpop.permute.xlu1 %107  ;;  %v113_v55 = vpop.permute.xlu0 %112 }
 0x1cd   :  { %v125_v56 = vmul.f32 %v108_v54, %v60_v52  ;;  %v126_v57 = vmul.f32 %v113_v55, %v61_v53 }
 0x1cf   :  { %v130_v60 = vsel %vm129_vm3, %v125_v56, 0.0  ;;  %v131_v61 = vsel %vm129_vm3, %v126_v57, 0.0 }
 0x1d0   :  { %v118_v59 = vpop.permute.xlu1 %117  ;;  %v132_v1 = vadd.f32 %v131_v61, %v130_v60 }
 0x1d1   :  { %v127_v62 = vmul.f32 %v118_v59, %v62_v58 }
 0x1d3   :  { %v133_v0 = vsel %vm129_vm3, %v127_v62, 0.0 }
 0x1d4   :  { %v123_v2 = vpop.permute.xlu1 %122  ;;  %v134_v4 = vadd.f32 %v133_v0, %v132_v1 }
 0x1d5   :  { %v128_v3 = vmul.f32 %v123_v2, %v63_v63 }
 0x1d7   :  { %v135_v5 = vsel %vm129_vm3, %v128_v3, 0.0 }
 0x1d8   :  { %v136_v6 = vadd.f32 %v135_v5, %v134_v4 }
 0x1da   :  { %v137_v7 = vrot.slane %v136_v6, 4 }
 0x1dc   :  { %v138_v8 = vadd.f32 %v137_v7, %v136_v6 }
 0x1de   :  { %v139_v9 = vrot.slane %v138_v8, 2 }
 0x1e0   :  { %v140_v10 = vadd.f32 %v139_v9, %v138_v8 }
 0x1e2   :  { %v141_v11 = vrot.slane %v140_v10, 1 }
 0x1e4   :  { %v142_v13 = vadd.f32 %v141_v11, %v140_v10 }
 0x1e6   :  { %v143_v14 = vadd.f32 %v142_v13, %v64_v12 }
 0x1e8   :  { %169 = vtanh.f32 %v143_v14 }
 0x1f5   :  { %v170_v15 = vpop.eup %169 }
 0x1f6   :  { %v145_v17 = vmul.f32 0.1, %v170_v15 }
 0x1f8   :  { %v149_v21 = vrot.slane %v145_v17, %v78_v20 }
 0x1fa   :  { %v150_v22 = vadd.f32 %v149_v21, %v48_v18  ;;  %v151_v23 = vadd.f32 %v149_v21, %v49_v19 }
 0x1fc   :  { %152 = vst.msk [vmem:[%s261_s2] sm:$0xff] %vm129_vm3, %v150_v22 }
 0x1fd   :  { %154 = vst.msk [vmem:[%s261_s2 + $0x8] sm:$0x1] %vm153_vm4, %v151_v23 }
 0x1fe   :  { %159 = vsyncpa [#allocation3], 1 }
 0x1ff   :  { %160 = vsyncpa [#allocation5], 1 }

</bundles_post_ra>
